<compile_context>
chip_gen: v6e
topology: v6e:2x2x1
jax: 0.10.0
libtpu: 0.0.40
codegen_flags: <defaults>
</compile_context>

<pallas_src>
import functools

import jax
import jax.numpy as jnp
from jax.experimental import pallas as pl
from jax.experimental.pallas import tpu as pltpu


def _round_up(x: int, m: int) -> int:
    return ((x + m - 1) // m) * m


def _mlp_kernel(x_ref, w1_ref, b1_ref, w2_ref, b2_ref, o_ref):
    # fc1: (TB, in) @ (in, hidden_p) -> f32 accumulate, bias + ReLU in f32.
    h = jnp.dot(x_ref[...], w1_ref[...], preferred_element_type=jnp.float32)
    h = jnp.maximum(h + b1_ref[...], 0.0)
    # fc2: cast the activation back to the MXU input dtype, accumulate in f32.
    y = jnp.dot(h.astype(w2_ref.dtype), w2_ref[...],
                preferred_element_type=jnp.float32)
    o_ref[...] = (y + b2_ref[...]).astype(o_ref.dtype)


@functools.partial(jax.jit, static_argnames=("block_b", "compute_dtype"))
def mlp_forward(x, w1, b1, w2, b2, *, block_b=256, compute_dtype=jnp.bfloat16):
    """x: (B, in_dim); w1: (in_dim, hidden); b1: (hidden,);
       w2: (hidden, out); b2: (out,).  Returns (B, out) in x.dtype."""
    B, in_dim = x.shape
    hidden_dim = w1.shape[1]
    out_dim = w2.shape[1]

    # Lane-dense padding of the "N" dims; batch padded to the tile size.
    hp = _round_up(hidden_dim, 128)
    op = _round_up(out_dim, 128)
    tb = min(_round_up(B, 8), block_b)
    bp = _round_up(B, tb)

    # Zero-pad + cast at the call boundary (bf16 in, f32 accumulate inside).
    xp = jnp.zeros((bp, in_dim), compute_dtype).at[:B, :].set(
        x.astype(compute_dtype))
    w1p = jnp.zeros((in_dim, hp), compute_dtype).at[:, :hidden_dim].set(
        w1.astype(compute_dtype))
    w2p = jnp.zeros((hp, op), compute_dtype).at[:hidden_dim, :out_dim].set(
        w2.astype(compute_dtype))
    b1p = jnp.zeros((1, hp), jnp.float32).at[0, :hidden_dim].set(
        b1.astype(jnp.float32))
    b2p = jnp.zeros((1, op), jnp.float32).at[0, :out_dim].set(
        b2.astype(jnp.float32))

    grid = (bp // tb,)

    out = pl.pallas_call(
        _mlp_kernel,
        out_shape=jax.ShapeDtypeStruct((bp, op), x.dtype),
        grid_spec=pltpu.PrefetchScalarGridSpec(
            num_scalar_prefetch=0,
            grid=grid,
            in_specs=[
                # x tile marches with the batch grid index.
                pl.BlockSpec((tb, in_dim), lambda i: (i, 0)),
                # Weights / biases: constant block index -> VMEM-resident.
                pl.BlockSpec((in_dim, hp), lambda i: (0, 0)),
                pl.BlockSpec((1, hp), lambda i: (0, 0)),
                pl.BlockSpec((hp, op), lambda i: (0, 0)),
                pl.BlockSpec((1, op), lambda i: (0, 0)),
            ],
            out_specs=pl.BlockSpec((tb, op), lambda i: (i, 0)),
        ),
        compiler_params=pltpu.CompilerParams(
            # Batch tiles are independent -> megacore sharding on v7x.
            dimension_semantics=("parallel",),
        ),
    )(xp, w1p, b1p, w2p, b2p)

    # Strip batch / lane padding.
    return out[:B, :out_dim]


def reference_mlp(x, w1, b1, w2, b2, compute_dtype=jnp.bfloat16):
    """Reference with the same bf16-input / f32-accumulate numerics."""
    xc = x.astype(compute_dtype)
    w1c = w1.astype(compute_dtype)
    w2c = w2.astype(compute_dtype)
    h = jnp.dot(xc, w1c, preferred_element_type=jnp.float32)
    h = jnp.maximum(h + b1.astype(jnp.float32), 0.0)
    y = jnp.dot(h.astype(compute_dtype), w2c,
                preferred_element_type=jnp.float32)
    return (y + b2.astype(jnp.float32)).astype(x.dtype)


if __name__ == "__main__":
    # Small shapes consistent with the module's forward: x is (B, in_dim).
    # block_b=8 so the batch is actually tiled (grid=(4,)) even at demo size.
    B, in_dim, hidden_dim, out_dim = 32, 32, 64, 16

    key = jax.random.PRNGKey(0)
    kx, kw1, kb1, kw2, kb2 = jax.random.split(key, 5)

    x = jax.random.normal(kx, (B, in_dim), dtype=jnp.float32)

    # Deterministic PyTorch-style uniform(-1/sqrt(fan_in), 1/sqrt(fan_in)) init.
    lim1 = 1.0 / jnp.sqrt(in_dim)
    w1 = jax.random.uniform(kw1, (in_dim, hidden_dim), jnp.float32, -lim1, lim1)
    b1 = jax.random.uniform(kb1, (hidden_dim,), jnp.float32, -lim1, lim1)
    lim2 = 1.0 / jnp.sqrt(hidden_dim)
    w2 = jax.random.uniform(kw2, (hidden_dim, out_dim), jnp.float32, -lim2, lim2)
    b2 = jax.random.uniform(kb2, (out_dim,), jnp.float32, -lim2, lim2)

    out = mlp_forward(x, w1, b1, w2, b2, block_b=8)
    out = jax.block_until_ready(out)
    assert out.shape == (B, out_dim)
    assert out.dtype == x.dtype

    # Check against a reference with matching bf16-in / f32-accumulate numerics.
    ref_bf16 = reference_mlp(x, w1, b1, w2, b2)
    assert jnp.allclose(out, ref_bf16, atol=2e-3, rtol=2e-3), \
        "mismatch vs bf16-matched reference"

    # Sanity-check against the pure-f32 math too (loose tolerance: bf16 inputs).
    h_f32 = jnp.maximum(x @ w1 + b1, 0.0)
    ref_f32 = h_f32 @ w2 + b2
    assert jnp.allclose(out, ref_f32, atol=5e-2, rtol=5e-2), \
        "mismatch vs f32 reference"

    print("KERNEL_OK")
</pallas_src>

<mosaic_0001>
module attributes {stable_mosaic.version = 11 : i64} {
  func.func @_mlp_kernel(%arg0: i32, %arg1: memref<8x32xbf16, #tpu.memory_space<vmem>>, %arg2: memref<32x128xbf16, #tpu.memory_space<vmem>>, %arg3: memref<1x128xf32, #tpu.memory_space<vmem>>, %arg4: memref<128x128xbf16, #tpu.memory_space<vmem>>, %arg5: memref<1x128xf32, #tpu.memory_space<vmem>>, %arg6: memref<8x128xf32, #tpu.memory_space<vmem>>) attributes {dimension_semantics = [#tpu.dimension_semantics<parallel>], iteration_bounds = array<i64: 4>, scalar_prefetch = 0 : i64, scratch_operands = 0 : i64, tpu.core_type = #tpu.core_type<tc>, window_params = [{transform_indices = @transform_0, window_bounds = array<i64: 8, 32>}, {pipeline_mode = #tpu.pipeline_mode<synchronous>, transform_indices = @transform_1, window_bounds = array<i64: 32, 128>}, {pipeline_mode = #tpu.pipeline_mode<synchronous>, transform_indices = @transform_2, window_bounds = array<i64: 1, 128>}, {pipeline_mode = #tpu.pipeline_mode<synchronous>, transform_indices = @transform_3, window_bounds = array<i64: 128, 128>}, {pipeline_mode = #tpu.pipeline_mode<synchronous>, transform_indices = @transform_4, window_bounds = array<i64: 1, 128>}, {transform_indices = @transform_5, window_bounds = array<i64: 8, 128>}]} {
    %c0 = arith.constant 0 : index
    %c0_0 = arith.constant 0 : index
    %0 = vector.load %arg1[%c0, %c0_0] : memref<8x32xbf16, #tpu.memory_space<vmem>>, vector<8x32xbf16>
    %c0_1 = arith.constant 0 : index
    %c0_2 = arith.constant 0 : index
    %1 = vector.load %arg2[%c0_1, %c0_2] : memref<32x128xbf16, #tpu.memory_space<vmem>>, vector<32x128xbf16>
    %cst = arith.constant dense<0.000000e+00> : vector<8x128xf32>
    %2 = tpu.matmul %0, %1, %cst {dimension_numbers = #tpu.dot_dimension_numbers<[1], [0], [0], [1], [0, 0, 1, 1], [], []>} : vector<8x32xbf16>, vector<32x128xbf16>, vector<8x128xf32> -> vector<8x128xf32>
    %c0_3 = arith.constant 0 : index
    %c0_4 = arith.constant 0 : index
    %3 = vector.load %arg3[%c0_3, %c0_4] : memref<1x128xf32, #tpu.memory_space<vmem>>, vector<1x128xf32>
    %4 = vector.broadcast %3 : vector<1x128xf32> to vector<8x128xf32>
    %5 = arith.addf %2, %4 : vector<8x128xf32>
    %cst_5 = arith.constant 0.000000e+00 : f32
    %6 = vector.broadcast %cst_5 : f32 to vector<8x128xf32>
    %7 = arith.maximumf %5, %6 : vector<8x128xf32>
    %8 = arith.truncf %7 : vector<8x128xf32> to vector<8x128xbf16>
    %c0_6 = arith.constant 0 : index
    %c0_7 = arith.constant 0 : index
    %9 = vector.load %arg4[%c0_6, %c0_7] : memref<128x128xbf16, #tpu.memory_space<vmem>>, vector<128x128xbf16>
    %cst_8 = arith.constant dense<0.000000e+00> : vector<8x128xf32>
    %10 = tpu.matmul %8, %9, %cst_8 {dimension_numbers = #tpu.dot_dimension_numbers<[1], [0], [0], [1], [0, 0, 1, 1], [], []>} : vector<8x128xbf16>, vector<128x128xbf16>, vector<8x128xf32> -> vector<8x128xf32>
    %c0_9 = arith.constant 0 : index
    %c0_10 = arith.constant 0 : index
    %11 = vector.load %arg5[%c0_9, %c0_10] : memref<1x128xf32, #tpu.memory_space<vmem>>, vector<1x128xf32>
    %12 = vector.broadcast %11 : vector<1x128xf32> to vector<8x128xf32>
    %13 = arith.addf %10, %12 : vector<8x128xf32>
    %c0_11 = arith.constant 0 : index
    %c0_12 = arith.constant 0 : index
    %14 = vector.load %arg6[%c0_11, %c0_12] : memref<8x128xf32, #tpu.memory_space<vmem>>, vector<8x128xf32>
    tpu.vector_store %arg6[%c0_11, %c0_12], %13 {strides = array<i32>} : memref<8x128xf32, #tpu.memory_space<vmem>>, vector<8x128xf32>,
    return
  }
  func.func @transform_0(%arg0: i32) -> (i32, i32) {
    %c0_i32 = arith.constant 0 : i32
    %c0_i32_0 = arith.constant 0 : i32
    return %arg0, %c0_i32 : i32, i32
  }
  func.func @transform_1(%arg0: i32) -> (i32, i32) {
    %c0_i32 = arith.constant 0 : i32
    %c0_i32_0 = arith.constant 0 : i32
    %c0_i32_1 = arith.constant 0 : i32
    return %c0_i32, %c0_i32_0 : i32, i32
  }
  func.func @transform_2(%arg0: i32) -> (i32, i32) {
    %c0_i32 = arith.constant 0 : i32
    %c0_i32_0 = arith.constant 0 : i32
    %c0_i32_1 = arith.constant 0 : i32
    return %c0_i32, %c0_i32_0 : i32, i32
  }
  func.func @transform_3(%arg0: i32) -> (i32, i32) {
    %c0_i32 = arith.constant 0 : i32
    %c0_i32_0 = arith.constant 0 : i32
    %c0_i32_1 = arith.constant 0 : i32
    return %c0_i32, %c0_i32_0 : i32, i32
  }
  func.func @transform_4(%arg0: i32) -> (i32, i32) {
    %c0_i32 = arith.constant 0 : i32
    %c0_i32_0 = arith.constant 0 : i32
    %c0_i32_1 = arith.constant 0 : i32
    return %c0_i32, %c0_i32_0 : i32, i32
  }
  func.func @transform_5(%arg0: i32) -> (i32, i32) {
    %c0_i32 = arith.constant 0 : i32
    %c0_i32_0 = arith.constant 0 : i32
    return %arg0, %c0_i32 : i32, i32
  }
}

</mosaic_0001>

<bundles_post_ra>
// kernel: mlp_forward.1
= control target key start
LH: loop header
LB: loop body
LE: loop exit
PB: predicated region body
PF: predicated region fallthrough
CT: control target
= control target key end

     0   :  { %s578_s18 = smov 0   ;;  %s635_s0 = inlined_call_operand.vmem [shape: bf16[32,32], index: 0, kind: input, shape index: {}]   ;;  %s636_s1 = inlined_call_operand.vmem [shape: bf16[32,128], index: 1, kind: input, shape index: {}]   ;;  %s637_s2 = inlined_call_operand.vmem [shape: f32[1,128], index: 2, kind: input, shape index: {}]   ;;  %s638_s3 = inlined_call_operand.vmem [shape: bf16[128,128], index: 3, kind: input, shape index: {}]   ;;  %s639_s4 = inlined_call_operand.vmem [shape: f32[1,128], index: 4, kind: input, shape index: {}]   ;;  %s640_s5 = inlined_call_operand.vmem [shape: f32[32,128], index: 5, kind: output, shape index: {}]  }
   0x1 LB: > { %s456_s19 = sadd.s32 4294967295, %s544_s18   ;;  %p460_p0 = scmp.ge.s32.totalorder %s544_s18, 1  ;;  %s544_s18 = sphi %s578_s18, %s15_s18  }
   0x2   : > { %p186_p1 = scmp.lt.s32.totalorder %s544_s18, 5 }
   0x4   : > { %p187_p2 = pnand %p460_p0, %p186_p1 }
   0x5   : > { %p212_p3 = scmp.lt.s32.totalorder (!%p187_p2), %s456_s19, 3 }
   0x6   : > { %190 = sbr.rel (%p187_p2) target bundleno = 418 (0x1a2), region = 40 }
   0xb   : > { %v528_v0 = vld [vmem:[%s636_s1 + $0x8] sm:$0xff]   ;;  %v546_v1 = vmov 0.0   ;;  %v529_v2 = vld [vmem:[%s636_s1] sm:$0xff]   ;;  %vm547_vm0 = vmmov 0   ;;  %v530_v3 = vld [vmem:[%s638_s3 + $0x38] sm:$0xff]   ;;  %s642_s19 = smov (!%p212_p3, %s456_s19), 3 }
   0xc   : > { %490 = vmatprep.subr.bf16.mxu0 %v546_v1  ;;  %498 = vmatprep.subr.bf16.mxu1 %v546_v1  ;;  %v531_v4 = vld [vmem:[%s638_s3 + $0x30] sm:$0xff]   ;;  %s461_s28 = sshll.u32 %s642_s19, 2  ;;  %vm245_vm1 = vcmask 261120   ;;  %v532_v6 = vld [vmem:[%s638_s3 + $0x28] sm:$0xff]   ;;  %v533_v7 = vld [vmem:[%s638_s3 + $0x20] sm:$0xff]   ;;  %s462_s23 = sshll.u32 %s642_s19, 3 }
   0xd   : > { %491 = vmatpush3.bf16.msra.mxu0 %v528_v0  ;;  %494 = vmatprep.mubr.msk.bf16.mxu0 %vm547_vm0, %v546_v1  ;;  %s215_s6 = scalar_lea.vmem %s635_s0, %s461_s28  ;;  %v534_v8 = vld [vmem:[%s638_s3 + $0x18] sm:$0xff]   ;;  %v535_v9 = vld [vmem:[%s638_s3 + $0x10] sm:$0xff]   ;;  %v536_v10 = vld [vmem:[%s638_s3 + $0x8] sm:$0xff]   ;;  %s219_s28 = scalar_lea.vmem %s640_s5, %s462_s23 }
   0xe   : > { %492 = vmatprep.subr.bf16.mxu0 %v546_v1  ;;  %514 = vmatprep.mubr.msk.bf16.mxu1 %vm547_vm0, %v546_v1  ;;  %v221_v5 = vld [vmem:[%s215_s6] sm:$0xf] }
   0xf   : > { %499 = vmatpush3.bf16.msra.mxu1 %v530_v3  ;;  %v537_v11 = vld [vmem:[%s638_s3] sm:$0xff]  }
  0x10   : > { %500 = vmatprep.subr.bf16.mxu1 %v546_v1  ;;  %v463_v12 = vld [vmem:[%s637_s2] ss:$0 sm:$0xff] }
  0x11   : > { %493 = vmatpush3.bf16.msra.mxu0 %v529_v2  ;;  %v467_v20 = vld [vmem:[%s639_s4] ss:$0 sm:$0xff] }
  0x13   : > { %501 = vmatpush3.bf16.msra.mxu1 %v531_v4 }
  0x14   : > { %495 = vmatmul.mubr.msk.bf16.vlgmr.msra.gmra.mxu0 %vm245_vm1, %v221_v5  ;;  %502 = vmatprep.subr.bf16.mxu1 %v546_v1 }
  0x17   : > { %503 = vmatpush3.bf16.msra.mxu1 %v532_v6 }
  0x18   : > { %504 = vmatprep.subr.bf16.mxu1 %v546_v1 }
  0x1b   : > { %505 = vmatpush3.bf16.msra.mxu1 %v533_v7 }
  0x1c   : > { %506 = vmatprep.subr.bf16.mxu1 %v546_v1 }
  0x1f   : > { %507 = vmatpush3.bf16.msra.mxu1 %v534_v8 }
  0x20   : > { %508 = vmatprep.subr.bf16.mxu1 %v546_v1 }
  0x23   : > { %509 = vmatpush3.bf16.msra.mxu1 %v535_v9 }
  0x24   : > { %510 = vmatprep.subr.bf16.mxu1 %v546_v1 }
  0x27   : > { %511 = vmatpush3.bf16.msra.mxu1 %v536_v10 }
  0x28   : > { %512 = vmatprep.subr.bf16.mxu1 %v546_v1 }
  0x2b   : > { %513 = vmatpush3.bf16.msra.mxu1 %v537_v11 }
  0xd4   : > { %v283_v13 = vpop.f32.mrf.mxu0 }
  0xd5   : > { %v284_v14 = vadd.f32 %v463_v12, %v283_v13 }
  0xd6   : > { %v496_v15 = vpop.f32.mrf.mxu0 }
  0xd7   : > { %v289_v16 = vmax.f32 %v284_v14, 0.0 }
  0xd8   : > { %v286_v17 = vpop.f32.mrf.mxu0 }
  0xd9   : > { %v290_v18 = vpack.c.bf16 %v289_v16, %v289_v16 }
  0xda   : > { %v497_v19 = vpop.f32.mrf.mxu0 }
  0xdb   : > { %515 = vmatmul.mubr.bf16.vlgmr.msra.gmra.mxu1 %v290_v18 }
 0x19b   : > { %v396_v21 = vpop.f32.mrf.mxu1 }
 0x19c   : > { %v397_v22 = vadd.f32 %v467_v20, %v396_v21 }
 0x19d   : > { %v516_v23 = vpop.f32.mrf.mxu1 }
 0x19e   : > { %402 = vst [vmem:[%s219_s28] sm:$0xff] %v397_v22 }
 0x19f   : > { %v399_v24 = vpop.f32.mrf.mxu1 }
 0x1a1   : > { %v517_v25 = vpop.f32.mrf.mxu1 }
 0x1a2 PF: > { %s15_s18 = sadd.s32 1, %s544_s18  }
 0x1a3   : > { %p12_p4 = scmp.ge.s32.totalorder %s15_s18, 6  }
 0x1a5   :  { %14 = sbr.rel (!%p12_p4) target bundleno = 1 (0x1), region = 70 }

</bundles_post_ra>
